<compile_context>
chip_gen: v7x
topology: tpu7x:2x2x1
jax: 0.10.0
libtpu: 0.0.40
codegen_flags: <defaults>
</compile_context>

<pallas_src>
import jax
import jax.numpy as jnp
from jax import lax
from jax.experimental import pallas as pl
from jax.experimental.pallas import tpu as pltpu


def _adaptive_grouping_kernel(feat_ref, w_ref, b_ref, pts_ref, out_ref):
    # feat_ref : VMEM (F, N) -- this batch's features, N on lanes
    # w_ref    : VMEM (T, F) -- nn.Linear weight (out_features, in_features)
    # b_ref    : VMEM (T, 1) -- nn.Linear bias as a column
    # pts_ref  : VMEM (N, Z) -- this batch's points
    # out_ref  : VMEM (T, Z) -- result tile for this batch
    feat_t = feat_ref[...].astype(jnp.float32)        # (F, N)
    w = w_ref[...].astype(jnp.float32)                # (T, F)
    b = b_ref[...].astype(jnp.float32)                # (T, 1)
    pts = pts_ref[...].astype(jnp.float32)            # (N, Z)

    # logits^T = W @ feat^T + b  -> (T, N); the module's softmax axis (dim -2 of
    # [B, N, T]) is now the lane axis.
    logits_t = lax.dot_general(
        w, feat_t,
        dimension_numbers=(((1,), (0,)), ((), ())),
        preferred_element_type=jnp.float32) + b       # (T, N) MXU

    # numerically stable softmax over N (lane-axis reductions on the XLU),
    # normalization deferred past the second matmul.
    m = jnp.max(logits_t, axis=-1, keepdims=True)     # (T, 1)
    e = jnp.exp(logits_t - m)                         # (T, N) EUP
    s = jnp.sum(e, axis=-1, keepdims=True)            # (T, 1)

    # einsum 'bnz,bnc->bcz'  ==  act^T @ points : (T, N) @ (N, Z) -> (T, Z).
    # Contract the *unnormalized* exp, then scale the small (T, Z) result.
    out_un = lax.dot_general(
        e, pts,
        dimension_numbers=(((1,), (0,)), ((), ())),
        preferred_element_type=jnp.float32)           # (T, Z) MXU

    inv_s = pl.reciprocal(s, approx=True)             # (T, 1) EUP, ~free slot
    out_ref[...] = (out_un * inv_s).astype(out_ref.dtype)   # single store per batch


def adaptive_grouping(points, feat, weight, bias):
    """points: [B, N, Z], feat: [B, N, F], weight: [T, F], bias: [T] -> [B, T, Z]."""
    B, N, Z = points.shape
    Fdim = feat.shape[-1]
    T = weight.shape[0]

    feat_t = jnp.transpose(feat, (0, 2, 1))           # [B, F, N]  (N lane-dense)
    b_col = bias.reshape(T, 1)                        # [T, 1]

    grid_spec = pltpu.PrefetchScalarGridSpec(
        num_scalar_prefetch=0,
        grid=(B,),
        in_specs=[
            pl.BlockSpec((None, Fdim, N), lambda b: (b, 0, 0)),   # feat_t
            pl.BlockSpec((T, Fdim), lambda b: (0, 0)),            # weight (re-used)
            pl.BlockSpec((T, 1), lambda b: (0, 0)),               # bias   (re-used)
            pl.BlockSpec((None, N, Z), lambda b: (b, 0, 0)),      # points
        ],
        out_specs=pl.BlockSpec((None, T, Z), lambda b: (b, 0, 0)),
    )
    return pl.pallas_call(
        _adaptive_grouping_kernel,
        out_shape=jax.ShapeDtypeStruct((B, T, Z), points.dtype),
        grid_spec=grid_spec,
        compiler_params=pltpu.CompilerParams(
            dimension_semantics=("parallel",)),       # batches are independent
    )(feat_t, weight, b_col, points)


def adaptive_grouping_ref(points, feat, weight, bias):
    """Pure-JAX reference mirroring the PyTorch module."""
    logits = jnp.einsum('bnf,tf->bnt', feat, weight) + bias        # Linear
    act = jax.nn.softmax(logits, axis=-2)                          # softmax over N
    return jnp.einsum('bnz,bnc->bcz', points, act)                 # [B, T, Z]


if __name__ == "__main__":
    key = jax.random.PRNGKey(0)
    k_pts, k_feat, k_w, k_b = jax.random.split(key, 4)

    B, N, Z, Fdim, T = 2, 128, 3, 32, 8   # batch, points, coords, feat_in, targets
    points = jax.random.normal(k_pts, (B, N, Z), dtype=jnp.float32)
    feat = jax.random.normal(k_feat, (B, N, Fdim), dtype=jnp.float32)
    weight = jax.random.normal(k_w, (T, Fdim), dtype=jnp.float32) * 0.1
    bias = jax.random.normal(k_b, (T,), dtype=jnp.float32) * 0.1

    out = adaptive_grouping(points, feat, weight, bias)
    out = jax.block_until_ready(out)

    ref = adaptive_grouping_ref(points, feat, weight, bias)
    assert out.shape == (B, T, Z), out.shape
    # tolerance leaves headroom for MXU default-precision differences vs XLA
    assert jnp.allclose(out, ref, atol=5e-3, rtol=5e-3), "mismatch vs reference"

    print("KERNEL_OK")
</pallas_src>

<mosaic_0001>
module attributes {stable_mosaic.version = 11 : i64} {
  func.func @_adaptive_grouping_kernel(%arg0: i32, %arg1: memref<1x32x128xf32, #tpu.memory_space<vmem>>, %arg2: memref<8x32xf32, #tpu.memory_space<vmem>>, %arg3: memref<8x1xf32, #tpu.memory_space<vmem>>, %arg4: memref<1x128x3xf32, #tpu.memory_space<vmem>>, %arg5: memref<1x8x3xf32, #tpu.memory_space<vmem>>) attributes {dimension_semantics = [#tpu.dimension_semantics<parallel>], iteration_bounds = array<i64: 2>, scalar_prefetch = 0 : i64, scratch_operands = 0 : i64, tpu.core_type = #tpu.core_type<tc>, window_params = [{transform_indices = @transform_0, window_bounds = array<i64: 1, 32, 128>}, {pipeline_mode = #tpu.pipeline_mode<synchronous>, transform_indices = @transform_1, window_bounds = array<i64: 8, 32>}, {pipeline_mode = #tpu.pipeline_mode<synchronous>, transform_indices = @transform_2, window_bounds = array<i64: 8, 1>}, {transform_indices = @transform_3, window_bounds = array<i64: 1, 128, 3>}, {transform_indices = @transform_4, window_bounds = array<i64: 1, 8, 3>}]} {
    %c0 = arith.constant 0 : index
    %c0_0 = arith.constant 0 : index
    %c0_1 = arith.constant 0 : index
    %0 = vector.load %arg1[%c0, %c0_0, %c0_1] : memref<1x32x128xf32, #tpu.memory_space<vmem>>, vector<1x32x128xf32>
    %1 = vector.shape_cast %0 : vector<1x32x128xf32> to vector<32x128xf32>
    %c0_2 = arith.constant 0 : index
    %c0_3 = arith.constant 0 : index
    %2 = vector.load %arg2[%c0_2, %c0_3] : memref<8x32xf32, #tpu.memory_space<vmem>>, vector<8x32xf32>
    %c0_4 = arith.constant 0 : index
    %c0_5 = arith.constant 0 : index
    %3 = vector.load %arg3[%c0_4, %c0_5] : memref<8x1xf32, #tpu.memory_space<vmem>>, vector<8x1xf32>
    %c0_6 = arith.constant 0 : index
    %c0_7 = arith.constant 0 : index
    %c0_8 = arith.constant 0 : index
    %4 = vector.load %arg4[%c0_6, %c0_7, %c0_8] : memref<1x128x3xf32, #tpu.memory_space<vmem>>, vector<1x128x3xf32>
    %5 = vector.shape_cast %4 : vector<1x128x3xf32> to vector<128x3xf32>
    %cst = arith.constant dense<0.000000e+00> : vector<8x128xf32>
    %6 = tpu.matmul %2, %1, %cst {dimension_numbers = #tpu.dot_dimension_numbers<[1], [0], [0], [1], [0, 0, 1, 1], [], []>} : vector<8x32xf32>, vector<32x128xf32>, vector<8x128xf32> -> vector<8x128xf32>
    %7 = vector.broadcast %3 : vector<8x1xf32> to vector<8x128xf32>
    %8 = arith.addf %6, %7 : vector<8x128xf32>
    %cst_9 = arith.constant dense<0xFF800000> : vector<8xf32>
    %9 = vector.multi_reduction <maximumf>, %8, %cst_9 [1] : vector<8x128xf32> to vector<8xf32>
    %10 = vector.shape_cast %9 : vector<8xf32> to vector<8x1xf32>
    %11 = vector.broadcast %10 : vector<8x1xf32> to vector<8x128xf32>
    %12 = arith.subf %8, %11 : vector<8x128xf32>
    %13 = math.exp %12 : vector<8x128xf32>
    %cst_10 = arith.constant dense<0.000000e+00> : vector<8xf32>
    %14 = vector.multi_reduction <add>, %13, %cst_10 [1] : vector<8x128xf32> to vector<8xf32>
    %15 = vector.shape_cast %14 : vector<8xf32> to vector<8x1xf32>
    %cst_11 = arith.constant dense<0.000000e+00> : vector<8x3xf32>
    %16 = tpu.matmul %13, %5, %cst_11 {dimension_numbers = #tpu.dot_dimension_numbers<[1], [0], [0], [1], [0, 0, 1, 1], [], []>} : vector<8x128xf32>, vector<128x3xf32>, vector<8x3xf32> -> vector<8x3xf32>
    %17 = tpu.reciprocal %15 {approx = true} : vector<8x1xf32> -> vector<8x1xf32>
    %18 = vector.broadcast %17 : vector<8x1xf32> to vector<8x3xf32>
    %19 = arith.mulf %16, %18 : vector<8x3xf32>
    %c0_12 = arith.constant 0 : index
    %c0_13 = arith.constant 0 : index
    %c0_14 = arith.constant 0 : index
    %20 = vector.load %arg5[%c0_12, %c0_13, %c0_14] : memref<1x8x3xf32, #tpu.memory_space<vmem>>, vector<1x8x3xf32>
    %21 = vector.shape_cast %20 : vector<1x8x3xf32> to vector<8x3xf32>
    %22 = vector.shape_cast %19 : vector<8x3xf32> to vector<1x8x3xf32>
    tpu.vector_store %arg5[%c0_12, %c0_13, %c0_14], %22 {strides = array<i32>} : memref<1x8x3xf32, #tpu.memory_space<vmem>>, vector<1x8x3xf32>,
    return
  }
  func.func @transform_0(%arg0: i32) -> (i32, i32, i32) {
    %c0_i32 = arith.constant 0 : i32
    %c0_i32_0 = arith.constant 0 : i32
    %c0_i32_1 = arith.constant 0 : i32
    return %arg0, %c0_i32, %c0_i32_0 : i32, i32, i32
  }
  func.func @transform_1(%arg0: i32) -> (i32, i32) {
    %c0_i32 = arith.constant 0 : i32
    %c0_i32_0 = arith.constant 0 : i32
    %c0_i32_1 = arith.constant 0 : i32
    return %c0_i32, %c0_i32_0 : i32, i32
  }
  func.func @transform_2(%arg0: i32) -> (i32, i32) {
    %c0_i32 = arith.constant 0 : i32
    %c0_i32_0 = arith.constant 0 : i32
    %c0_i32_1 = arith.constant 0 : i32
    return %c0_i32, %c0_i32_0 : i32, i32
  }
  func.func @transform_3(%arg0: i32) -> (i32, i32, i32) {
    %c0_i32 = arith.constant 0 : i32
    %c0_i32_0 = arith.constant 0 : i32
    %c0_i32_1 = arith.constant 0 : i32
    return %arg0, %c0_i32, %c0_i32_0 : i32, i32, i32
  }
  func.func @transform_4(%arg0: i32) -> (i32, i32, i32) {
    %c0_i32 = arith.constant 0 : i32
    %c0_i32_0 = arith.constant 0 : i32
    %c0_i32_1 = arith.constant 0 : i32
    return %arg0, %c0_i32, %c0_i32_0 : i32, i32, i32
  }
}

</mosaic_0001>

<bundles_post_ra>
// kernel: tpu_custom_call.1
= control target key start
LH: loop header
LB: loop body
LE: loop exit
PB: predicated region body
PF: predicated region fallthrough
CT: control target
= control target key end

     0   :  { %s630_s15 = smov 0   ;;  %s689_s0 = inlined_call_operand.vmem [shape: f32[2,32,128], index: 0, kind: input, shape index: {}]   ;;  %s690_s1 = inlined_call_operand.vmem [shape: f32[8,32], index: 1, kind: input, shape index: {}]   ;;  %s691_s2 = inlined_call_operand.vmem [shape: f32[8,1], index: 2, kind: input, shape index: {}]   ;;  %s692_s3 = inlined_call_operand.vmem [shape: f32[2,128,3], index: 3, kind: input, shape index: {}]   ;;  %s693_s4 = inlined_call_operand.vmem [shape: f32[2,8,3], index: 4, kind: output, shape index: {}]  }
   0x1 LB: > { %s463_s16 = sadd.s32 4294967295, %s599_s15   ;;  %p467_p0 = scmp.ge.s32.totalorder %s599_s15, 1  ;;  %s599_s15 = sphi %s630_s15, %s14_s15  }
   0x2   : > { %p172_p1 = scmp.lt.s32.totalorder %s599_s15, 3 }
   0x4   : > { %p173_p2 = pnand %p467_p0, %p172_p1 }
   0x5   : > { %p202_p3 = scmp.lt.s32.totalorder (!%p173_p2), %s463_s16, 1  ;;  %v601_v0 = vmov (!%p173_p2), 0.0|0.0   ;;  %vm602_vm0 = vmmov (!%p173_p2), 0   ;;  %v603_v1 = vmov (!%p173_p2), 0.0   ;;  %v221_v2 = vld [vmem:[%s691_s2] sm:$0xff] (!%p173_p2)  ;;  %v604_v3 = vmov (!%p173_p2), 0  }
   0x6   : > { %176 = sbr.rel (%p173_p2) target bundleno = 612 (0x264), region = 36  ;;  %546 = vmatprep.subr.bf16.mxu0 (!%p173_p2), %v601_v0  ;;  %508 = vmatprep.mubr.msk.f32.mxu0 (!%p173_p2), %vm602_vm0, %v603_v1  ;;  %v220_v10 = vld [vmem:[%s690_s1] sm:$0xff] (!%p173_p2)  ;;  %vm243_vm1 = vcmask (!%p173_p2), 261120   ;;  %vm396_vm2 = vcmask (!%p173_p2), 23552  }
   0x7   : > { %588 = vset.pattern.permute.xlu0 (!%p173_p2), %v604_v3  ;;  %552 = vmatprep.subr.bf16.mxu1 (!%p173_p2), %v601_v0 }
   0x8   : > { %240 = vperm.xlu0 (!%p173_p2), %588, %v221_v2   ;;  %543 = vmatprep.mubr.msk.f32.mxu1 (!%p173_p2), %vm602_vm0, %v603_v1 }
   0xd   : > { %s695_s16 = smov (!%p202_p3, %s463_s16), 1 }
   0xe   : > { %s476_s19 = sshll.u32 %s695_s16, 5  ;;  %s477_s25 = sshll.u32 %s695_s16, 7 }
   0xf   : > { %s206_s22 = scalar_lea.vmem %s689_s0, %s476_s19  ;;  %s657_s28 = scalar_lea.vmem %s692_s3, %s477_s25 }
  0x10   : > { %v216_v4 = vld [vmem:[%s206_s22] sm:$0xff]  ;;  %v217_v5 = vld [vmem:[%s206_s22 + $0x8] sm:$0xff]  ;;  %v218_v6 = vld [vmem:[%s206_s22 + $0x10] sm:$0xff]  ;;  %s472_s29 = sshll.u32 %s695_s16, 3 }
  0x11   : > { %v547_v7 = vpack.c.bf16 %v217_v5, %v216_v4  ;;  %v219_v8 = vld [vmem:[%s206_s22 + $0x18] sm:$0xff]  ;;  %v222_v11 = vld [vmem:[%s657_s28] sm:$0xff]  ;;  %v223_v12 = vld [vmem:[%s657_s28 + $0x8] sm:$0xff]  ;;  %s215_s6 = scalar_lea.vmem %s693_s4, %s472_s29 }
  0x12   : > { %v550_v9 = vpack.c.bf16 %v219_v8, %v218_v6  ;;  %v224_v13 = vld [vmem:[%s657_s28 + $0x10] sm:$0xff]  ;;  %v553_v14 = vpack.c.bf16 %v223_v12, %v222_v11  ;;  %v225_v15 = vld [vmem:[%s657_s28 + $0x18] sm:$0xff]  ;;  %v226_v17 = vld [vmem:[%s657_s28 + $0x20] sm:$0xff] }
  0x13   : > { %548 = vmatpush3.bf16.msra.mxu0 %v547_v7  ;;  %v556_v16 = vpack.c.bf16 %v225_v15, %v224_v13  ;;  %v227_v18 = vld [vmem:[%s657_s28 + $0x28] sm:$0xff]  ;;  %v228_v20 = vld [vmem:[%s657_s28 + $0x30] sm:$0xff]  ;;  %v229_v21 = vld [vmem:[%s657_s28 + $0x38] sm:$0xff] }
  0x14   : > { %549 = vmatprep.subr.bf16.mxu0 %v601_v0  ;;  %554 = vmatpush3.bf16.msra.mxu1 %v553_v14  ;;  %v559_v19 = vpack.c.bf16 %v227_v18, %v226_v17  ;;  %v562_v22 = vpack.c.bf16 %v229_v21, %v228_v20  ;;  %v230_v27 = vld [vmem:[%s657_s28 + $0x40] sm:$0xff]  ;;  %v231_v28 = vld [vmem:[%s657_s28 + $0x48] sm:$0xff]  ;;  %v232_v30 = vld [vmem:[%s657_s28 + $0x50] sm:$0xff] }
  0x15   : > { %555 = vmatprep.subr.bf16.mxu1 %v601_v0  ;;  %v565_v29 = vpack.c.bf16 %v231_v28, %v230_v27  ;;  %v233_v31 = vld [vmem:[%s657_s28 + $0x58] sm:$0xff]  ;;  %v234_v33 = vld [vmem:[%s657_s28 + $0x60] sm:$0xff]  ;;  %v235_v34 = vld [vmem:[%s657_s28 + $0x68] sm:$0xff] }
  0x16   : > { %v568_v32 = vpack.c.bf16 %v233_v31, %v232_v30  ;;  %v571_v35 = vpack.c.bf16 %v235_v34, %v234_v33  ;;  %v236_v36 = vld [vmem:[%s657_s28 + $0x70] sm:$0xff]  ;;  %v237_v37 = vld [vmem:[%s657_s28 + $0x78] sm:$0xff] }
  0x17   : > { %551 = vmatpush3.bf16.msra.mxu0 %v550_v9  ;;  %v574_v38 = vpack.c.bf16 %v237_v37, %v236_v36 }
  0x18   : > { %557 = vmatpush3.bf16.msra.mxu1 %v556_v16 }
  0x19   : > { %558 = vmatprep.subr.bf16.mxu1 %v601_v0 }
  0x1a   : > { %509 = vmatmul.mubr.msk.f32.vlgmr.msra.gmra.mrb[0].mxu0 %vm243_vm1, %v220_v10 }
  0x1c   : > { %560 = vmatpush3.bf16.msra.mxu1 %v559_v19 }
  0x1d   : > { %561 = vmatprep.subr.bf16.mxu1 %v601_v0 }
  0x20   : > { %563 = vmatpush3.bf16.msra.mxu1 %v562_v22 }
  0x21   : > { %564 = vmatprep.subr.bf16.mxu1 %v601_v0 }
  0x24   : > { %566 = vmatpush3.bf16.msra.mxu1 %v565_v29 }
  0x25   : > { %567 = vmatprep.subr.bf16.mxu1 %v601_v0 }
  0x28   : > { %569 = vmatpush3.bf16.msra.mxu1 %v568_v32 }
  0x29   : > { %570 = vmatprep.subr.bf16.mxu1 %v601_v0 }
  0x2c   : > { %572 = vmatpush3.bf16.msra.mxu1 %v571_v35 }
  0x2d   : > { %573 = vmatprep.subr.bf16.mxu1 %v601_v0 }
  0x30   : > { %575 = vmatpush3.bf16.msra.mxu1 %v574_v38 }
  0x87   : > { %v241_v23 = vpop.permute.xlu0 %240 }
  0xed   : > { %v313_v24 = vpop.f32.mrb[0].mxu0 }
  0xee   : > { %v314_v25 = vadd.f32 %v313_v24, %v241_v23  ;;  %v510_v26 = vpop.f32.mrb[1].mxu0 }
  0xf0   : > { %317 = vmax.xlane.f32.xlu0 %v314_v25 }
 0x17d   : > { %v318_v39 = vpop.xlane.xlu0 %317 }
 0x17e   : > { %v319_v40 = vsub.f32 %v314_v25, %v318_v39 }
 0x180   : > { %v320_v41 = vmul.f32 1.442695, %v319_v40 }
 0x182   : > { %589 = vpow2.f32 %v320_v41 }
 0x18c   : > { %v590_v42 = vpop.eup %589 }
 0x18d   : > { %322 = vadd.xlane.f32.xlu1 %v590_v42  ;;  %544 = vmatmul.mubr.f32.vlgmr.msra.gmra.mrb[0].mxu1 %v590_v42 }
 0x21a   : > { %v323_v43 = vpop.xlane.xlu1 %322 }
 0x21b   : > { %591 = vrcp.f32 %v323_v43 }
 0x225   : > { %v592_v44 = vpop.eup %591 }
 0x260   : > { %v390_v45 = vpop.f32.mrb[0].mxu1 }
 0x261   : > { %v395_v46 = vmul.f32 %v592_v44, %v390_v45  ;;  %v545_v47 = vpop.f32.mrb[1].mxu1 }
 0x263   : > { %397 = vst.msk [vmem:[%s215_s6] sm:$0xff] %vm396_vm2, %v395_v46 }
 0x264 PF: > { %s14_s15 = sadd.s32 1, %s599_s15  }
 0x265   : > { %p11_p4 = scmp.ge.s32.totalorder %s14_s15, 4  }
 0x267   :  { %13 = sbr.rel (!%p11_p4) target bundleno = 1 (0x1), region = 69 }

</bundles_post_ra>
